<compile_context>
chip_gen: v6e
topology: v6e:2x2x1
jax: 0.10.0
libtpu: 0.0.40
codegen_flags: <defaults>
</compile_context>

<pallas_src>
import functools

import jax
import jax.numpy as jnp
from jax.experimental import pallas as pl
from jax.experimental.pallas import tpu as pltpu


def _round_up(n, m):
    return ((n + m - 1) // m) * m


def _align_dim(n):
    # 256-align larger dims so the 2x256^2 MXUs (v6e/v7x) are fully fed; 128 is enough
    # (and wastes less padding) for already-small dims, and 256 is still 128-aligned on v5e.
    return _round_up(n, 256) if n > 128 else 128


def _vmem_capacity_bytes():
    try:
        return int(pltpu.get_tpu_info().vmem_capacity_bytes)
    except Exception:
        return 64 * 1024 * 1024  # v7x per-core VMEM: safe lower bound


def _num_tensorcores():
    try:
        return max(1, int(getattr(jax.devices()[0], "num_cores", 1)))
    except Exception:
        return 1


def _footprint_bytes(tm, tf, Dp, Fp, cbytes, obytes):
    """Double-buffered VMEM footprint of one grid step."""
    return (2 * tm * Dp * cbytes            # x tile
            + 2 * Dp * (2 * tf) * cbytes    # fused W1|W3 tile
            + 2 * tf * Dp * cbytes          # W2 tile
            + 2 * (2 * Fp) * 4              # fused bias (resident, f32)
            + 2 * Dp * 4                    # b2 (resident, f32)
            + 2 * tm * Dp * obytes          # output tile
            + tm * Dp * 4)                  # f32 accumulator scratch


def prepare_ffn_swiglu_params(w1, b1, w3, b3, w2, b2, *, compute_dtype=None,
                              tm_max=512, tf_max=512, vmem_budget=None):
    """One-time (hoisted out of the hot path) padding / fusion / casting of the weights.

    w1/w3: [D, F] (pre-transposed vs. torch Linear), w2: [F, D], biases 1-D.
    """
    D, F = w1.shape
    assert w3.shape == (D, F) and w2.shape == (F, D)
    assert b1.shape == (F,) and b3.shape == (F,) and b2.shape == (D,)
    if compute_dtype is None:
        compute_dtype = w1.dtype  # pass jnp.bfloat16 for the MXU-native fast path
    cbytes = jnp.dtype(compute_dtype).itemsize

    Dp = _align_dim(D)
    Fp0 = _align_dim(F)
    if vmem_budget is None:
        vmem_budget = int(0.6 * min(_vmem_capacity_bytes(), 128 * 1024 * 1024))

    # Choose tf (multiple of 128), shrinking first so the conservative (tm=tm_max) footprint
    # fits the VMEM budget; keeps double buffering intact on v7x's 64 MiB.
    tm_hint = max(8, (tm_max // 8) * 8)
    tf = max(128, (min(tf_max, Fp0) // 128) * 128)
    while tf > 128 and _footprint_bytes(tm_hint, tf, Dp, _round_up(Fp0, tf),
                                        cbytes, 4) > vmem_budget:
        tf = max(128, ((tf // 2) // 128) * 128)
    Fp = _round_up(Fp0, tf)
    grid_f = Fp // tf

    cd = compute_dtype
    w1_p = jnp.pad(w1.astype(cd), ((0, Dp - D), (0, Fp - F)))
    w3_p = jnp.pad(w3.astype(cd), ((0, Dp - D), (0, Fp - F)))
    # Per-F-tile fused layout: tile kf holds [W1 tile kf | W3 tile kf], so the kernel issues a
    # single (Dp, 2*tf) MXU stream per step and slices h1/h3 statically.
    w13 = jnp.concatenate(
        [w1_p.reshape(Dp, grid_f, tf), w3_p.reshape(Dp, grid_f, tf)], axis=2
    ).reshape(Dp, 2 * Fp)

    b1_p = jnp.pad(b1.astype(jnp.float32), (0, Fp - F)).reshape(grid_f, tf)
    b3_p = jnp.pad(b3.astype(jnp.float32), (0, Fp - F)).reshape(grid_f, tf)
    b13 = jnp.concatenate([b1_p, b3_p], axis=1)                     # (grid_f, 2*tf)

    w2_p = jnp.pad(w2.astype(cd), ((0, Fp - F), (0, Dp - D)))
    b2_p = jnp.pad(b2.astype(jnp.float32), (0, Dp - D)).reshape(1, Dp)

    # Zero-padded F columns + zero bias give SiLU(0)*0 = 0, so padded lanes contribute
    # nothing to fc2; padded D columns are zero in x and W2 and are sliced off at the end.
    return dict(w13=w13, b13=b13, w2=w2_p, b2=b2_p, D=D, F=F, Dp=Dp, Fp=Fp,
                tf=tf, grid_f=grid_f, compute_dtype=cd,
                vmem_budget=vmem_budget, tm_max=tm_max)


def _ffn_swiglu_kernel(x_ref, w13_ref, b13_ref, w2_ref, b2_ref, o_ref, acc_ref,
                       *, tf, compute_dtype):
    kf = pl.program_id(1)

    x = x_ref[...]                                                    # (tm, Dp)
    # Fused gate matmul: one (tm, Dp) x (Dp, 2*tf) MXU stream, f32 accumulation.
    h12 = jnp.dot(x, w13_ref[...], preferred_element_type=jnp.float32)
    h12 = h12 + b13_ref[pl.ds(kf, 1), :]          # resident fused (b1|b3) row for this F tile
    h1 = h12[:, :tf]                              # gate branch  (x @ W1 + b1)
    h3 = h12[:, tf:]                              # linear branch (x @ W3 + b3)
    h = (h1 * jax.nn.sigmoid(h1)) * h3            # SwiGLU, f32 (tm, tf)

    # fc2 partial product for this F tile.
    part = jnp.dot(h.astype(compute_dtype), w2_ref[...],
                   preferred_element_type=jnp.float32)

    @pl.when(kf == 0)
    def _():                                       # direct write: no redundant zero-fill
        acc_ref[...] = part

    @pl.when(kf != 0)
    def _():
        acc_ref[...] += part

    @pl.when(kf == pl.num_programs(1) - 1)
    def _():
        o_ref[...] = (acc_ref[...] + b2_ref[...]).astype(o_ref.dtype)


def ffn_swiglu(x, params, *, tm_max=None, ensure_two_m_tiles=None):
    """x: [B, S, D] -> [B, S, D], using params from prepare_ffn_swiglu_params."""
    B, S, D = x.shape
    assert D == params["D"]
    Dp, Fp, tf, grid_f = params["Dp"], params["Fp"], params["tf"], params["grid_f"]
    cd = params["compute_dtype"]
    cbytes = jnp.dtype(cd).itemsize
    out_dtype = x.dtype
    obytes = jnp.dtype(out_dtype).itemsize
    budget = params["vmem_budget"]
    if tm_max is None:
        tm_max = params["tm_max"]
    M = B * S

    # Row tile: multiple of the dtype sublane count (8 f32 / 16 bf16), shrunk against VMEM.
    sub = max(8, 32 // cbytes)
    tm = min(max(sub, (tm_max // sub) * sub), _round_up(M, sub))
    while tm > sub and _footprint_bytes(tm, tf, Dp, Fp, cbytes, obytes) > budget:
        tm = max(sub, ((tm // 2) // sub) * sub)
    # TODO(synk): for very large embed_dim a D-contraction grid axis would be needed; here we
    # only cap tm/tf against the VMEM budget (sufficient for typical ESM embed dims).

    Mp = _round_up(M, tm)
    grid_m = Mp // tm
    if ensure_two_m_tiles is None:
        ensure_two_m_tiles = _num_tensorcores() >= 2        # v7x megacore: shard M across TCs
    if (ensure_two_m_tiles and grid_m == 1 and tm >= 2 * sub
            and (tm // 2) % sub == 0 and M > tm // 2):
        tm //= 2
        Mp = _round_up(M, tm)
        grid_m = Mp // tm

    x_p = jnp.pad(x.reshape(M, D).astype(cd), ((0, Mp - M), (0, Dp - D)))

    cap = _vmem_capacity_bytes()
    vmem_limit = min(int(0.85 * cap), 112 * 1024 * 1024)

    cost = pl.CostEstimate(
        flops=6 * Mp * Dp * Fp,                       # gate (2 matmuls) + fc2
        transcendentals=Mp * Fp,                      # sigmoid
        bytes_accessed=int(Mp * Dp * (cbytes + obytes)
                           + grid_m * (3 * Dp * Fp * cbytes + 2 * Fp * 4)
                           + Dp * 4),
    )

    two_tf = 2 * tf
    kernel = functools.partial(_ffn_swiglu_kernel, tf=tf, compute_dtype=cd)
    out = pl.pallas_call(
        kernel,
        out_shape=jax.ShapeDtypeStruct((Mp, Dp), out_dtype),
        grid_spec=pltpu.PrefetchScalarGridSpec(
            num_scalar_prefetch=0,
            grid=(grid_m, grid_f),
            in_specs=[
                pl.BlockSpec((tm, Dp), lambda i, kf: (i, 0)),           # x row tile
                pl.BlockSpec((Dp, two_tf), lambda i, kf: (0, kf)),      # fused W1|W3 F-tile
                pl.BlockSpec((grid_f, two_tf), lambda i, kf: (0, 0)),   # fused bias (resident)
                pl.BlockSpec((tf, Dp), lambda i, kf: (kf, 0)),          # W2 F-tile
                pl.BlockSpec((1, Dp), lambda i, kf: (0, 0)),            # b2 (resident)
            ],
            out_specs=pl.BlockSpec((tm, Dp), lambda i, kf: (i, 0)),
            scratch_shapes=[pltpu.VMEM((tm, Dp), jnp.float32)],         # fc2 accumulator
        ),
        compiler_params=pltpu.CompilerParams(
            dimension_semantics=("parallel", "arbitrary"),
            vmem_limit_bytes=vmem_limit,
        ),
        cost_estimate=cost,
    )(x_p, params["w13"], params["b13"], params["w2"], params["b2"])

    return out[:M, :D].reshape(B, S, D)


def _reference(x, w1, b1, w3, b3, w2, b2):
    h1 = x @ w1 + b1
    h3 = x @ w3 + b3
    h = (h1 * jax.nn.sigmoid(h1)) * h3
    return h @ w2 + b2


if __name__ == "__main__":
    # Small shapes consistent with the module.
    B, S = 2, 8
    embed_dim = 32
    ffn_embed_dim = 64

    key = jax.random.PRNGKey(0)
    kx, k1, kb1, k3, kb3, k2, kb2 = jax.random.split(key, 7)

    x = jax.random.normal(kx, (B, S, embed_dim), dtype=jnp.float32)

    # Deterministic synthetic params (nn.Linear shapes, stored [in, out]). SwiGLU's fused
    # w12 Linear(embed_dim, 2*ffn_embed_dim) is represented as its W1 / W3 halves.
    scale_in = 1.0 / jnp.sqrt(embed_dim)
    scale_ffn = 1.0 / jnp.sqrt(ffn_embed_dim)
    w1 = jax.random.normal(k1, (embed_dim, ffn_embed_dim), jnp.float32) * scale_in
    b1 = jax.random.normal(kb1, (ffn_embed_dim,), jnp.float32) * 0.01
    w3 = jax.random.normal(k3, (embed_dim, ffn_embed_dim), jnp.float32) * scale_in
    b3 = jax.random.normal(kb3, (ffn_embed_dim,), jnp.float32) * 0.01
    w2 = jax.random.normal(k2, (ffn_embed_dim, embed_dim), jnp.float32) * scale_ffn
    b2 = jax.random.normal(kb2, (embed_dim,), jnp.float32) * 0.01

    y_ref = _reference(x, w1, b1, w3, b3, w2, b2)

    # f32-operand path: matches the reference tightly.
    params_f32 = prepare_ffn_swiglu_params(w1, b1, w3, b3, w2, b2)
    y = jax.block_until_ready(ffn_swiglu(x, params_f32))
    assert jnp.allclose(y, y_ref, atol=1e-4, rtol=1e-4), "f32 mismatch vs reference"

    # bf16-operand fast path (MXU-native, f32 accumulation): loose tolerance vs f32 reference.
    params_bf16 = prepare_ffn_swiglu_params(w1, b1, w3, b3, w2, b2,
                                            compute_dtype=jnp.bfloat16)
    y_bf16 = jax.block_until_ready(ffn_swiglu(x, params_bf16))
    assert jnp.allclose(y_bf16, y_ref, atol=1.2e-1, rtol=1e-1), "bf16 mismatch vs reference"

    print("KERNEL_OK")
</pallas_src>

<mosaic_0001>
module attributes {stable_mosaic.version = 11 : i64} {
  func.func @_ffn_swiglu_kernel(%arg0: i32, %arg1: i32, %arg2: memref<16x128xf32, #tpu.memory_space<vmem>>, %arg3: memref<128x256xf32, #tpu.memory_space<vmem>>, %arg4: memref<1x256xf32, #tpu.memory_space<vmem>>, %arg5: memref<128x128xf32, #tpu.memory_space<vmem>>, %arg6: memref<1x128xf32, #tpu.memory_space<vmem>>, %arg7: memref<16x128xf32, #tpu.memory_space<vmem>>, %arg8: memref<16x128xf32, #tpu.memory_space<vmem>>) attributes {dimension_semantics = [#tpu.dimension_semantics<parallel>, #tpu.dimension_semantics<arbitrary>], iteration_bounds = array<i64: 1, 1>, scalar_prefetch = 0 : i64, scratch_operands = 1 : i64, tpu.core_type = #tpu.core_type<tc>, window_params = [{transform_indices = @transform_0, window_bounds = array<i64: 16, 128>}, {transform_indices = @transform_1, window_bounds = array<i64: 128, 256>}, {pipeline_mode = #tpu.pipeline_mode<synchronous>, transform_indices = @transform_2, window_bounds = array<i64: 1, 256>}, {transform_indices = @transform_3, window_bounds = array<i64: 128, 128>}, {pipeline_mode = #tpu.pipeline_mode<synchronous>, transform_indices = @transform_4, window_bounds = array<i64: 1, 128>}, {transform_indices = @transform_5, window_bounds = array<i64: 16, 128>}]} {
    %c0 = arith.constant 0 : index
    %c0_0 = arith.constant 0 : index
    %0 = vector.load %arg2[%c0, %c0_0] : memref<16x128xf32, #tpu.memory_space<vmem>>, vector<16x128xf32>
    %c0_1 = arith.constant 0 : index
    %c0_2 = arith.constant 0 : index
    %1 = vector.load %arg3[%c0_1, %c0_2] : memref<128x256xf32, #tpu.memory_space<vmem>>, vector<128x256xf32>
    %cst = arith.constant dense<0.000000e+00> : vector<16x256xf32>
    %2 = tpu.matmul %0, %1, %cst {dimension_numbers = #tpu.dot_dimension_numbers<[1], [0], [0], [1], [0, 0, 1, 1], [], []>} : vector<16x128xf32>, vector<128x256xf32>, vector<16x256xf32> -> vector<16x256xf32>
    %3 = arith.index_cast %arg1 : i32 to index
    %c0_3 = arith.constant 0 : index
    %4 = vector.load %arg4[%3, %c0_3] : memref<1x256xf32, #tpu.memory_space<vmem>>, vector<1x256xf32>
    %5 = vector.broadcast %4 : vector<1x256xf32> to vector<16x256xf32>
    %6 = arith.addf %2, %5 : vector<16x256xf32>
    %7 = vector.extract_strided_slice %6 {offsets = [0, 0], sizes = [16, 128], strides = [1, 1]} : vector<16x256xf32> to vector<16x128xf32>
    %8 = vector.extract_strided_slice %6 {offsets = [0, 128], sizes = [16, 128], strides = [1, 1]} : vector<16x256xf32> to vector<16x128xf32>
    %9 = arith.negf %7 : vector<16x128xf32>
    %10 = math.exp %9 : vector<16x128xf32>
    %cst_4 = arith.constant 1.000000e+00 : f32
    %11 = vector.broadcast %cst_4 : f32 to vector<16x128xf32>
    %12 = arith.addf %11, %10 : vector<16x128xf32>
    %13 = arith.divf %11, %12 : vector<16x128xf32>
    %14 = arith.mulf %7, %13 : vector<16x128xf32>
    %15 = arith.mulf %14, %8 : vector<16x128xf32>
    %c0_5 = arith.constant 0 : index
    %c0_6 = arith.constant 0 : index
    %16 = vector.load %arg5[%c0_5, %c0_6] : memref<128x128xf32, #tpu.memory_space<vmem>>, vector<128x128xf32>
    %cst_7 = arith.constant dense<0.000000e+00> : vector<16x128xf32>
    %17 = tpu.matmul %15, %16, %cst_7 {dimension_numbers = #tpu.dot_dimension_numbers<[1], [0], [0], [1], [0, 0, 1, 1], [], []>} : vector<16x128xf32>, vector<128x128xf32>, vector<16x128xf32> -> vector<16x128xf32>
    %c0_i32 = arith.constant 0 : i32
    %18 = arith.cmpi eq, %arg1, %c0_i32 : i32
    %19 = arith.extui %18 : i1 to i32
    %c0_i32_8 = arith.constant 0 : i32
    %20 = arith.cmpi ne, %19, %c0_i32_8 : i32
    scf.if %20 {
      %c0_13 = arith.constant 0 : index
      %c0_14 = arith.constant 0 : index
      %27 = vector.load %arg8[%c0_13, %c0_14] : memref<16x128xf32, #tpu.memory_space<vmem>>, vector<16x128xf32>
      tpu.vector_store %arg8[%c0_13, %c0_14], %17 {strides = array<i32>} : memref<16x128xf32, #tpu.memory_space<vmem>>, vector<16x128xf32>,
    } else {
    }
    %c0_i32_9 = arith.constant 0 : i32
    %21 = arith.cmpi ne, %arg1, %c0_i32_9 : i32
    %22 = arith.extui %21 : i1 to i32
    %c0_i32_10 = arith.constant 0 : i32
    %23 = arith.cmpi ne, %22, %c0_i32_10 : i32
    scf.if %23 {
      %c0_13 = arith.constant 0 : index
      %c0_14 = arith.constant 0 : index
      %27 = vector.load %arg8[%c0_13, %c0_14] : memref<16x128xf32, #tpu.memory_space<vmem>>, vector<16x128xf32>
      %28 = arith.addf %27, %17 : vector<16x128xf32>
      %c0_15 = arith.constant 0 : index
      %c0_16 = arith.constant 0 : index
      %29 = vector.load %arg8[%c0_15, %c0_16] : memref<16x128xf32, #tpu.memory_space<vmem>>, vector<16x128xf32>
      tpu.vector_store %arg8[%c0_15, %c0_16], %28 {strides = array<i32>} : memref<16x128xf32, #tpu.memory_space<vmem>>, vector<16x128xf32>,
    } else {
    }
    %c0_i32_11 = arith.constant 0 : i32
    %24 = arith.cmpi eq, %arg1, %c0_i32_11 : i32
    %25 = arith.extui %24 : i1 to i32
    %c0_i32_12 = arith.constant 0 : i32
    %26 = arith.cmpi ne, %25, %c0_i32_12 : i32
    scf.if %26 {
      %c0_13 = arith.constant 0 : index
      %c0_14 = arith.constant 0 : index
      %27 = vector.load %arg8[%c0_13, %c0_14] : memref<16x128xf32, #tpu.memory_space<vmem>>, vector<16x128xf32>
      %c0_15 = arith.constant 0 : index
      %c0_16 = arith.constant 0 : index
      %28 = vector.load %arg6[%c0_15, %c0_16] : memref<1x128xf32, #tpu.memory_space<vmem>>, vector<1x128xf32>
      %29 = vector.broadcast %28 : vector<1x128xf32> to vector<16x128xf32>
      %30 = arith.addf %27, %29 : vector<16x128xf32>
      %c0_17 = arith.constant 0 : index
      %c0_18 = arith.constant 0 : index
      %31 = vector.load %arg7[%c0_17, %c0_18] : memref<16x128xf32, #tpu.memory_space<vmem>>, vector<16x128xf32>
      tpu.vector_store %arg7[%c0_17, %c0_18], %30 {strides = array<i32>} : memref<16x128xf32, #tpu.memory_space<vmem>>, vector<16x128xf32>,
    } else {
    }
    return
  }
  func.func @transform_0(%arg0: i32, %arg1: i32) -> (i32, i32) {
    %c0_i32 = arith.constant 0 : i32
    %c0_i32_0 = arith.constant 0 : i32
    return %arg0, %c0_i32 : i32, i32
  }
  func.func @transform_1(%arg0: i32, %arg1: i32) -> (i32, i32) {
    %c0_i32 = arith.constant 0 : i32
    %c0_i32_0 = arith.constant 0 : i32
    return %c0_i32, %arg1 : i32, i32
  }
  func.func @transform_2(%arg0: i32, %arg1: i32) -> (i32, i32) {
    %c0_i32 = arith.constant 0 : i32
    %c0_i32_0 = arith.constant 0 : i32
    %c0_i32_1 = arith.constant 0 : i32
    return %c0_i32, %c0_i32_0 : i32, i32
  }
  func.func @transform_3(%arg0: i32, %arg1: i32) -> (i32, i32) {
    %c0_i32 = arith.constant 0 : i32
    %c0_i32_0 = arith.constant 0 : i32
    return %arg1, %c0_i32 : i32, i32
  }
  func.func @transform_4(%arg0: i32, %arg1: i32) -> (i32, i32) {
    %c0_i32 = arith.constant 0 : i32
    %c0_i32_0 = arith.constant 0 : i32
    %c0_i32_1 = arith.constant 0 : i32
    return %c0_i32, %c0_i32_0 : i32, i32
  }
  func.func @transform_5(%arg0: i32, %arg1: i32) -> (i32, i32) {
    %c0_i32 = arith.constant 0 : i32
    %c0_i32_0 = arith.constant 0 : i32
    return %arg0, %c0_i32 : i32, i32
  }
}

</mosaic_0001>

<bundles_post_ra>
// kernel: tpu_custom_call.1
= control target key start
LH: loop header
LB: loop body
LE: loop exit
PB: predicated region body
PF: predicated region fallthrough
CT: control target
= control target key end

     0   :  { %10 = vsyncpa [#allocation4], 0  ;;  %s571_s0 = inlined_call_operand.hbm [shape: f32[16,128], index: 0, kind: input, shape index: {}]   ;;  %s572_s1 = inlined_call_operand.hbm [shape: f32[128,256], index: 1, kind: input, shape index: {}]   ;;  %s573_s2 = inlined_call_operand.vmem [shape: f32[1,256], index: 2, kind: input, shape index: {}]   ;;  %s574_s3 = inlined_call_operand.hbm [shape: f32[128,128], index: 3, kind: input, shape index: {}]   ;;  %s575_s4 = inlined_call_operand.vmem [shape: f32[1,128], index: 4, kind: input, shape index: {}]   ;;  %s576_s5 = inlined_call_operand.hbm [shape: f32[16,128], index: 5, kind: output, shape index: {}]  }
   0x1   :  { %11 = vsyncpa [#allocation7], 0 }
   0x2   :  { %12 = vsyncpa [#allocation5], 0  ;;  %s503_s18 = smov [#allocation6]  }
   0x3   :  { %s30_s19 = sshll.u32 %s503_s18, 4  ;;  %s31_s19 = int_to_ptr.vmem [resolvable:$true] %s30_s19 }
   0x4   :  { %s425_s20 = scalar_lea.vmem %s31_s19, 4096  ;;  %p430_p1 = scmp.lt.s32.totalorder %s31_s19, %s31_s19 }
   0x5   :  { %p426_p0 = scmp.ne.s32.totalorder %s31_s19, %s425_s20  ;;  %p431_p2 = scmp.lt.s32.totalorder %s425_s20, %s425_s20 }
   0x7   :  { %p432_p3 = por %p431_p2, %p430_p1 }
   0x9   :  { %p433_p4 = pnand %p432_p3, %p426_p0 }
   0xb   :  { %436 = shalt.err (!%p433_p4)
}
   0xc   :  { %s504_s21 = smov 256   ;;  %s505_s22 = smov 16  }
   0xd   :  { %36 = dma.hbm_to_vmem [thread:$0]  %s572_s1, 4096, %s31_s19, [#allocation7], %s504_s21, %s504_s21, %s505_s22  }
   0xe   :  { %s506_s25 = smov [#allocation3]  }
   0xf   :  { %s18_s26 = sshll.u32 %s506_s25, 4  ;;  %s19_s26 = int_to_ptr.vmem [resolvable:$true] %s18_s26 }
  0x10   :  { %s445_s27 = scalar_lea.vmem %s19_s26, 256  ;;  %p450_p6 = scmp.lt.s32.totalorder %s19_s26, %s19_s26 }
  0x11   :  { %p446_p5 = scmp.ne.s32.totalorder %s19_s26, %s445_s27  ;;  %p451_p7 = scmp.lt.s32.totalorder %s445_s27, %s445_s27 }
  0x13   :  { %p452_p8 = por %p451_p7, %p450_p6 }
  0x15   :  { %p453_p9 = pnand %p452_p8, %p446_p5 }
  0x17   :  { %456 = shalt.err (!%p453_p9)
}
  0x18   :  { %s507_s28 = smov 128   ;;  %s508_s29 = smov 8  }
  0x19   :  { %24 = dma.hbm_to_vmem [thread:$0]  %s571_s0, 256, %s19_s26, [#allocation4], %s507_s28, %s507_s28, %s508_s29  }
  0x1a   :  { %s509_s1 = smov [#allocation8]  }
  0x1b   :  { %s44_s7 = sshll.u32 %s509_s1, 4  ;;  %s45_s7 = int_to_ptr.vmem [resolvable:$true] %s44_s7 }
  0x1c   :  { %s465_s8 = scalar_lea.vmem %s45_s7, 2048  ;;  %p470_p11 = scmp.lt.s32.totalorder %s45_s7, %s45_s7 }
  0x1d   :  { %p466_p10 = scmp.ne.s32.totalorder %s45_s7, %s465_s8  ;;  %p471_p12 = scmp.lt.s32.totalorder %s465_s8, %s465_s8 }
  0x1f   :  { %p472_p13 = por %p471_p12, %p470_p11 }
  0x21   :  { %p473_p0 = pnand %p472_p13, %p466_p10 }
  0x23   :  { %476 = shalt.err (!%p473_p0)
}
  0x24   :  { %50 = dma.hbm_to_vmem [thread:$0]  %s574_s3, 2048, %s45_s7, [#allocation7], %s507_s28, %s507_s28, %s508_s29  }
  0x25   :  { %497 = dma.done.wait [#allocation4], 256  }
  0x26   :  { %498 = vsyncadd [#allocation4], 4294967040 }
  0x27   :  { %499 = dma.done.wait [#allocation7], 6144  }
  0x28   :  { %500 = vsyncadd [#allocation7], 4294961152  ;;  %v510_v0 = vmov 0.0   ;;  %v95_v1 = vld [vmem:[#allocation6 + $0xf8] sm:$0xff]  ;;  %v94_v2 = vld [vmem:[#allocation6 + $0xf0] sm:$0xff]  ;;  %v100_v51 = vlaneseq  ;;  %s511_s12 = smov [#allocation9]  }
  0x29   :  { %174 = vmatprep.mubr.f32.mxu0 %v510_v0  ;;  %v93_v3 = vld [vmem:[#allocation6 + $0xe8] sm:$0xff]  ;;  %110 = vmatprep.subr.mxu0 %v95_v1  ;;  %v92_v4 = vld [vmem:[#allocation6 + $0xe0] sm:$0xff]  ;;  %v91_v5 = vld [vmem:[#allocation6 + $0xd8] sm:$0xff]  ;;  %s331_s13 = sshll.u32 %s511_s12, 4  ;;  %s332_s13 = int_to_ptr.vmem [resolvable:$true] %s331_s13 }
  0x2a   :  { %111 = vmatpush1.msra.mxu0 %v94_v2  ;;  %v90_v6 = vld [vmem:[#allocation6 + $0xd0] sm:$0xff]  ;;  %v89_v7 = vld [vmem:[#allocation6 + $0xc8] sm:$0xff]  ;;  %v88_v8 = vld [vmem:[#allocation6 + $0xc0] sm:$0xff]  ;;  %v101_v52 = vshrl.u32 %v100_v51, 7  ;;  %s477_s14 = scalar_lea.vmem %s332_s13, 256  ;;  %p482_p2 = scmp.lt.s32.totalorder %s332_s13, %s332_s13 }
  0x2b   :  { %112 = vmatprep.subr.mxu0 %v93_v3  ;;  %v87_v9 = vld [vmem:[#allocation6 + $0xb8] sm:$0xff]  ;;  %v86_v10 = vld [vmem:[#allocation6 + $0xb0] sm:$0xff]  ;;  %v85_v11 = vld [vmem:[#allocation6 + $0xa8] sm:$0xff]  ;;  %p478_p1 = scmp.ne.s32.totalorder %s332_s13, %s477_s14  ;;  %p483_p3 = scmp.lt.s32.totalorder %s477_s14, %s477_s14 }
  0x2c   :  { %113 = vmatpush1.msra.mxu0 %v92_v4  ;;  %v84_v12 = vld [vmem:[#allocation6 + $0xa0] sm:$0xff]  ;;  %v83_v13 = vld [vmem:[#allocation6 + $0x98] sm:$0xff]  ;;  %v82_v14 = vld [vmem:[#allocation6 + $0x90] sm:$0xff]  ;;  %v102_v53 = vsub.s32 0, %v101_v52  ;;  %v106_v3 = vsub.s32 1, %v101_v52 }
  0x2d   :  { %114 = vmatprep.subr.mxu0 %v91_v5  ;;  %v81_v15 = vld [vmem:[#allocation6 + $0x88] sm:$0xff]  ;;  %v80_v16 = vld [vmem:[#allocation6 + $0x80] sm:$0xff]  ;;  %v79_v17 = vld [vmem:[#allocation6 + $0x78] sm:$0xff]  ;;  %p484_p4 = por %p483_p3, %p482_p2 }
  0x2e   :  { %115 = vmatpush1.msra.mxu0 %v90_v6  ;;  %v78_v18 = vld [vmem:[#allocation6 + $0x70] sm:$0xff]  ;;  %v77_v19 = vld [vmem:[#allocation6 + $0x68] sm:$0xff]  ;;  %v76_v20 = vld [vmem:[#allocation6 + $0x60] sm:$0xff] }
  0x2f   :  { %116 = vmatprep.subr.mxu0 %v89_v7  ;;  %v75_v21 = vld [vmem:[#allocation6 + $0x58] sm:$0xff]  ;;  %v74_v22 = vld [vmem:[#allocation6 + $0x50] sm:$0xff]  ;;  %v73_v23 = vld [vmem:[#allocation6 + $0x48] sm:$0xff]  ;;  %p485_p5 = pnand %p484_p4, %p478_p1 }
  0x30   :  { %117 = vmatpush1.msra.mxu0 %v88_v8  ;;  %v72_v24 = vld [vmem:[#allocation6 + $0x40] sm:$0xff]  ;;  %v71_v25 = vld [vmem:[#allocation6 + $0x38] sm:$0xff]  ;;  %v70_v26 = vld [vmem:[#allocation6 + $0x30] sm:$0xff] }
  0x31   :  { %118 = vmatprep.subr.mxu0 %v87_v9  ;;  %v69_v27 = vld [vmem:[#allocation6 + $0x28] sm:$0xff]  ;;  %v68_v28 = vld [vmem:[#allocation6 + $0x20] sm:$0xff]  ;;  %v67_v29 = vld [vmem:[#allocation6 + $0x18] sm:$0xff] }
  0x32   :  { %119 = vmatpush1.msra.mxu0 %v86_v10  ;;  %v66_v30 = vld [vmem:[#allocation6 + $0x10] sm:$0xff]  ;;  %v65_v31 = vld [vmem:[#allocation6 + $0x8] sm:$0xff]  ;;  %v64_v32 = vld [vmem:[#allocation6] sm:$0xff] }
  0x33   :  { %120 = vmatprep.subr.mxu0 %v85_v11  ;;  %v62_v33 = vld [vmem:[#allocation3] sm:$0xff]  ;;  %v63_v34 = vld [vmem:[#allocation3 + $0x8] sm:$0xff]  ;;  %v216_v37 = vld [vmem:[#allocation8 + $0x68] sm:$0xff] }
  0x34   :  { %121 = vmatpush1.msra.mxu0 %v84_v12  ;;  %v218_v35 = vld [vmem:[#allocation8 + $0x78] sm:$0xff]  ;;  %v217_v36 = vld [vmem:[#allocation8 + $0x70] sm:$0xff]  ;;  %v215_v38 = vld [vmem:[#allocation8 + $0x60] sm:$0xff] }
  0x35   :  { %122 = vmatprep.subr.mxu0 %v83_v13  ;;  %365 = vmatprep.subr.mxu1 %v218_v35  ;;  %v214_v39 = vld [vmem:[#allocation8 + $0x58] sm:$0xff]  ;;  %v213_v40 = vld [vmem:[#allocation8 + $0x50] sm:$0xff]  ;;  %v212_v41 = vld [vmem:[#allocation8 + $0x48] sm:$0xff] }
  0x36   :  { %123 = vmatpush1.msra.mxu0 %v82_v14  ;;  %366 = vmatpush3.msra.mxu1 %v218_v35  ;;  %v211_v42 = vld [vmem:[#allocation8 + $0x40] sm:$0xff]  ;;  %v210_v43 = vld [vmem:[#allocation8 + $0x38] sm:$0xff]  ;;  %v209_v44 = vld [vmem:[#allocation8 + $0x30] sm:$0xff] }
  0x37   :  { %124 = vmatprep.subr.mxu0 %v81_v15  ;;  %367 = vmatprep.subr.mxu1 %v217_v36  ;;  %v208_v45 = vld [vmem:[#allocation8 + $0x28] sm:$0xff]  ;;  %v207_v46 = vld [vmem:[#allocation8 + $0x20] sm:$0xff]  ;;  %v206_v47 = vld [vmem:[#allocation8 + $0x18] sm:$0xff] }
  0x38   :  { %125 = vmatpush1.msra.mxu0 %v80_v16  ;;  %368 = vmatpush3.msra.mxu1 %v217_v36  ;;  %v205_v48 = vld [vmem:[#allocation8 + $0x10] sm:$0xff]  ;;  %v204_v49 = vld [vmem:[#allocation8 + $0x8] sm:$0xff]  ;;  %v203_v50 = vld [vmem:[#allocation8] sm:$0xff] }
  0x39   :  { %126 = vmatprep.subr.mxu0 %v79_v17  ;;  %369 = vmatprep.subr.mxu1 %v216_v37  ;;  %v98_v54 = vld [vmem:[%s573_s2] sm:$0x3] }
  0x3a   :  { %127 = vmatpush1.msra.mxu0 %v78_v18  ;;  %370 = vmatpush3.msra.mxu1 %v216_v37  ;;  %v103_v55 = vrot.slane %v98_v54, %v102_v53  ;;  %v107_v4 = vrot.slane %v98_v54, %v106_v3  ;;  %v346_v14 = vld [vmem:[%s575_s4] ss:$0 sm:$0xff] }
  0x3b   :  { %128 = vmatprep.subr.mxu0 %v77_v19  ;;  %371 = vmatprep.subr.mxu1 %v215_v38 }
  0x3c   :  { %129 = vmatpush1.msra.mxu0 %v76_v20  ;;  %372 = vmatpush3.msra.mxu1 %v215_v38 }
  0x3d   :  { %130 = vmatprep.subr.mxu0 %v75_v21  ;;  %373 = vmatprep.subr.mxu1 %v214_v39 }
  0x3e   :  { %131 = vmatpush1.msra.mxu0 %v74_v22  ;;  %374 = vmatpush3.msra.mxu1 %v214_v39 }
  0x3f   :  { %132 = vmatprep.subr.mxu0 %v73_v23  ;;  %375 = vmatprep.subr.mxu1 %v213_v40 }
  0x40   :  { %133 = vmatpush1.msra.mxu0 %v72_v24  ;;  %376 = vmatpush3.msra.mxu1 %v213_v40 }
  0x41   :  { %134 = vmatprep.subr.mxu0 %v71_v25  ;;  %377 = vmatprep.subr.mxu1 %v212_v41 }
  0x42   :  { %135 = vmatpush1.msra.mxu0 %v70_v26  ;;  %378 = vmatpush3.msra.mxu1 %v212_v41 }
  0x43   :  { %136 = vmatprep.subr.mxu0 %v69_v27  ;;  %379 = vmatprep.subr.mxu1 %v211_v42 }
  0x44   :  { %137 = vmatpush1.msra.mxu0 %v68_v28  ;;  %380 = vmatpush3.msra.mxu1 %v211_v42 }
  0x45   :  { %138 = vmatprep.subr.mxu0 %v67_v29  ;;  %381 = vmatprep.subr.mxu1 %v210_v43 }
  0x46   :  { %139 = vmatpush1.msra.mxu0 %v66_v30  ;;  %382 = vmatpush3.msra.mxu1 %v210_v43 }
  0x47   :  { %140 = vmatprep.subr.mxu0 %v65_v31  ;;  %383 = vmatprep.subr.mxu1 %v209_v44 }
  0x48   :  { %141 = vmatpush1.msra.mxu0 %v64_v32  ;;  %384 = vmatpush3.msra.mxu1 %v209_v44 }
  0x49   :  { %175 = vmatmul.mubr.f32.vlgmr.msra.gmra.mxu0 %v62_v33  ;;  %385 = vmatprep.subr.mxu1 %v208_v45 }
  0x4a   :  { %180 = vmatprep.mubr.f32.mxu0 %v510_v0  ;;  %386 = vmatpush3.msra.mxu1 %v208_v45 }
  0x4b   :  { %387 = vmatprep.subr.mxu1 %v207_v46 }
  0x4c   :  { %388 = vmatpush3.msra.mxu1 %v207_v46 }
  0x4d   :  { %181 = vmatmul.mubr.f32.gmra.mxu0 %v63_v34  ;;  %389 = vmatprep.subr.mxu1 %v206_v47 }
  0x4e   :  { %390 = vmatpush3.msra.mxu1 %v206_v47 }
  0x4f   :  { %391 = vmatprep.subr.mxu1 %v205_v48 }
  0x50   :  { %392 = vmatpush3.msra.mxu1 %v205_v48 }
  0x51   :  { %393 = vmatprep.subr.mxu1 %v204_v49 }
  0x52   :  { %394 = vmatpush3.msra.mxu1 %v204_v49 }
  0x53   :  { %395 = vmatprep.subr.mxu1 %v203_v50 }
  0x54   :  { %396 = vmatpush3.msra.mxu1 %v203_v50 }
 0x109   :  { %v176_v56 = vpop.f32.mrf.mxu0 }
 0x10a   :  { %v177_v57 = vadd.f32 %v176_v56, %v103_v55 }
 0x10b   :  { %v178_v58 = vpop.f32.mrf.mxu0 }
 0x10c   :  { %v344_v59 = vmul.f32 -1.442695, %v177_v57  ;;  %v179_v6 = vadd.f32 %v178_v58, %v107_v4 }
 0x10d   :  { %v182_v60 = vpop.f32.mrf.mxu0 }
 0x10e   :  { %409 = vpow2.f32 %v344_v59  ;;  %v183_v61 = vadd.f32 %v182_v60, %v103_v55 }
 0x10f   :  { %v184_v8 = vpop.f32.mrf.mxu0 }
 0x110   :  { %v345_v62 = vmul.f32 -1.442695, %v183_v61  ;;  %v185_v12 = vadd.f32 %v184_v8, %v107_v4 }
 0x112   :  { %411 = vpow2.f32 %v345_v62 }
 0x11b   :  { %v410_v63 = vpop.eup %409 }
 0x11c   :  { %v193_v0 = vadd.f32 1.0, %v410_v63 }
 0x11e   :  { %413 = vrcp.f32 %v193_v0 }
 0x11f   :  { %v412_v1 = vpop.eup %411 }
 0x120   :  { %v194_v2 = vadd.f32 1.0, %v412_v1 }
 0x122   :  { %415 = vrcp.f32 %v194_v2 }
 0x12b   :  { %v414_v5 = vpop.eup %413 }
 0x12c   :  { %v199_v7 = vmul.f32 %v414_v5, %v177_v57 }
 0x12e   :  { %v201_v9 = vmul.f32 %v199_v7, %v179_v6 }
 0x12f   :  { %v416_v10 = vpop.eup %415 }
 0x130   :  { %v200_v11 = vmul.f32 %v416_v10, %v183_v61  ;;  %397 = vmatprep.mubr.f32.mxu1 %v201_v9 }
 0x132   :  { %v202_v13 = vmul.f32 %v200_v11, %v185_v12 }
 0x134   :  { %398 = vmatmul.mubr.f32.vlgmr.msra.gmra.mxu1 %v202_v13 }
 0x1f4   :  { %v399_v15 = vpop.f32.mrf.mxu1 }
 0x1f5   :  { %v323_v16 = vadd.f32 %v399_v15, %v346_v14 }
 0x1f6   :  { %v285_v17 = vpop.f32.mrf.mxu1 }
 0x1f7   :  { %325 = vst [vmem:[#allocation9 + $0x8] sm:$0xff] %v323_v16  ;;  %v322_v18 = vadd.f32 %v346_v14, %v285_v17 }
 0x1f9   :  { %324 = vst [vmem:[#allocation9] sm:$0xff] %v322_v18 }
 0x1fa   :  { %488 = shalt.err (!%p485_p5)
}
 0x1fb   :  { %337 = dma.vmem_to_hbm [thread:$0]  %s332_s13, 256, %s576_s5, [#allocation5], %s507_s28, %s507_s28, %s508_s29  }
 0x1fc   :  { %501 = dma.done.wait [#allocation5], 256  }
 0x1fd   :  { %502 = vsyncadd [#allocation5], 4294967040 }
 0x1fe   :  { %341 = vsyncpa [#allocation4], 1 }
 0x1ff   :  { %342 = vsyncpa [#allocation7], 1 }
 0x200   :  { %343 = vsyncpa [#allocation5], 1 }

</bundles_post_ra>
